<compile_context>
chip_gen: v7x
topology: tpu7x:2x2x1
jax: 0.10.0
libtpu: 0.0.40
codegen_flags: <defaults>
</compile_context>

<pallas_src>
import functools

import jax
import jax.numpy as jnp
from jax.experimental import pallas as pl
from jax.experimental.pallas import tpu as pltpu


def gaussian_merge_kernel(z_ref, mu1_ref, lv1_ref, w_ref, b_ref, eps_ref,
                          sample_ref, mu_ref, lv_ref, *, dout):
    z = z_ref[...]
    w = w_ref[...]
    if z.dtype != w.dtype:               # bf16-weight path: feed the MXU bf16 x bf16
        z = z.astype(w.dtype)

    # One fused matmul for both Linear layers, f32 accumulation on the MXU.
    fused = jnp.dot(z, w, preferred_element_type=jnp.float32) + b_ref[...]
    mu2 = fused[:, :dout]
    lv2 = fused[:, dout:]

    # Precision-weighted Gaussian merge (elementwise, VPU/EUP).
    p1 = jnp.exp(-lv1_ref[...])          # 1 / exp(log_var1)
    p2 = jnp.exp(-lv2)                   # 1 / exp(log_var2)
    denom = p1 + p2
    var = pl.reciprocal(denom, approx=False)   # var == 1/(p1+p2), EUP divide
    mu = (mu1_ref[...] * p1 + mu2 * p2) * var
    log_var = jnp.log(var + 1e-8)

    # Reparametrization: std = exp(0.5*log(var+1e-8)) == sqrt(var+1e-8).
    std = jnp.sqrt(var + 1e-8)
    sample_ref[...] = mu + eps_ref[...] * std
    mu_ref[...] = mu
    lv_ref[...] = log_var


def _pick_tile_b(B):
    """Largest 8-aligned tile <= 512 that divides B and yields >= 2 grid steps."""
    for t in (512, 256, 128, 64, 32, 16, 8):
        if t < B and B % t == 0:
            return t
    return B


def gaussian_merge(z, mu1, log_var1, w_mu, b_mu, w_lv, b_lv, eps, *,
                   tile_b=None, matmul_dtype=jnp.float32):
    """z: [B, Din]; mu1, log_var1, eps: [B, Dout]; w_*: [Din, Dout]; b_*: [1, Dout]."""
    B, Din = z.shape
    Dout = w_mu.shape[1]
    assert w_lv.shape == (Din, Dout) and b_mu.shape == (1, Dout) and b_lv.shape == (1, Dout)

    if tile_b is None:
        tile_b = _pick_tile_b(B)
    assert tile_b == B or (B % tile_b == 0 and tile_b % 8 == 0), (
        "tile_b must divide B and be a multiple of 8 (f32 sublane), or equal B")

    # Fuse both Linear layers into a single [Din, 2*Dout] weight / [1, 2*Dout] bias.
    # (Storing the weight in matmul_dtype also halves weight DMA on the bf16 path.)
    w_fused = jnp.concatenate([w_mu, w_lv], axis=1).astype(matmul_dtype)
    b_fused = jnp.concatenate([b_mu, b_lv], axis=1).astype(jnp.float32)

    grid = (B // tile_b,)

    z_spec = pl.BlockSpec((tile_b, Din), lambda i: (i, 0))
    io_spec = pl.BlockSpec((tile_b, Dout), lambda i: (i, 0))
    # Grid-invariant weights/bias: single-buffer to halve their VMEM footprint.
    w_spec = pl.BlockSpec((Din, 2 * Dout), lambda i: (0, 0),
                          pipeline_mode=pl.Buffered(1))
    b_spec = pl.BlockSpec((1, 2 * Dout), lambda i: (0, 0),
                          pipeline_mode=pl.Buffered(1))

    # Rough resident-VMEM estimate: double-buffered per-step tiles (z + 3 in + 3 out)
    # plus the single-buffered fused weight/bias.  Only raise the scoped limit if
    # the 32 MiB default would be exceeded; keep headroom under v7x's 64 MiB.
    # TODO(synk): for Din*Dout weights beyond a few MiB, add a Dout/Din grid axis
    # instead of growing vmem_limit_bytes further.
    f32 = 4
    w_bytes = Din * 2 * Dout * jnp.dtype(matmul_dtype).itemsize + 2 * Dout * f32
    tile_bytes = tile_b * (Din + 7 * Dout) * f32
    est = 2 * tile_bytes + w_bytes
    vmem_limit = min(int(est * 1.5), 60 << 20) if est > (30 << 20) else None

    kernel = functools.partial(gaussian_merge_kernel, dout=Dout)

    out_shapes = (
        jax.ShapeDtypeStruct((B, Dout), jnp.float32),  # sample
        jax.ShapeDtypeStruct((B, Dout), jnp.float32),  # mu
        jax.ShapeDtypeStruct((B, Dout), jnp.float32),  # log_var
    )

    return pl.pallas_call(
        kernel,
        out_shape=out_shapes,
        grid_spec=pltpu.PrefetchScalarGridSpec(
            num_scalar_prefetch=0,
            grid=grid,
            in_specs=[
                z_spec,    # z          [B, Din]
                io_spec,   # mu1        [B, Dout]
                io_spec,   # log_var1   [B, Dout]
                w_spec,    # W_fused    [Din, 2*Dout]
                b_spec,    # b_fused    [1, 2*Dout]
                io_spec,   # eps        [B, Dout]
            ],
            out_specs=[io_spec, io_spec, io_spec],
        ),
        compiler_params=pltpu.CompilerParams(
            dimension_semantics=("parallel",),
            vmem_limit_bytes=vmem_limit),
    )(z, mu1, log_var1, w_fused, b_fused, eps)


def reference(z, mu1, log_var1, w_mu, b_mu, w_lv, b_lv, eps):
    mu2 = z @ w_mu + b_mu
    lv2 = z @ w_lv + b_lv
    p1 = 1.0 / jnp.exp(log_var1)
    p2 = 1.0 / jnp.exp(lv2)
    mu = (mu1 * p1 + mu2 * p2) / (p1 + p2)
    var = 1.0 / (p1 + p2)
    log_var = jnp.log(var + 1e-8)
    sample = mu + eps * jnp.exp(0.5 * log_var)
    return sample, mu, log_var


if __name__ == "__main__":
    # Small shapes implied by the forward: z is [B, in_features],
    # mu1 / log_var1 / eps are [B, out_features].  B=16 -> 2 grid steps.
    B, Din, Dout = 16, 32, 32

    key = jax.random.PRNGKey(0)
    k_z, k_mu1, k_lv1, k_wm, k_bm, k_wl, k_bl, k_eps = jax.random.split(key, 8)

    z = jax.random.normal(k_z, (B, Din), dtype=jnp.float32)
    mu1 = jax.random.normal(k_mu1, (B, Dout), dtype=jnp.float32)
    log_var1 = 0.1 * jax.random.normal(k_lv1, (B, Dout), dtype=jnp.float32)

    # Deterministic parameter init (PyTorch nn.Linear shapes: W [Dout, Din], b [Dout]).
    # Stored pre-transposed as [Din, Dout] for the kernel's z @ W matmul.
    scale = 1.0 / jnp.sqrt(jnp.float32(Din))
    w_mu = scale * jax.random.normal(k_wm, (Din, Dout), dtype=jnp.float32)
    b_mu = scale * jax.random.normal(k_bm, (1, Dout), dtype=jnp.float32)
    w_lv = scale * jax.random.normal(k_wl, (Din, Dout), dtype=jnp.float32)
    b_lv = scale * jax.random.normal(k_bl, (1, Dout), dtype=jnp.float32)

    # Reparametrize noise generated outside the kernel for determinism.
    eps = jax.random.normal(k_eps, (B, Dout), dtype=jnp.float32)

    # f32 MXU path: bit-for-bit close to the reference.
    sample, mu, log_var = gaussian_merge(z, mu1, log_var1, w_mu, b_mu, w_lv, b_lv, eps)
    jax.block_until_ready((sample, mu, log_var))

    ref_sample, ref_mu, ref_lv = reference(z, mu1, log_var1, w_mu, b_mu, w_lv, b_lv, eps)
    assert jnp.allclose(sample, ref_sample, atol=1e-5, rtol=1e-5)
    assert jnp.allclose(mu, ref_mu, atol=1e-5, rtol=1e-5)
    assert jnp.allclose(log_var, ref_lv, atol=1e-5, rtol=1e-5)

    # bf16 MXU-input path (native v6e/v7x matmul rate); loose tolerance check.
    s_bf, mu_bf, lv_bf = gaussian_merge(z, mu1, log_var1, w_mu, b_mu, w_lv, b_lv, eps,
                                        matmul_dtype=jnp.bfloat16)
    jax.block_until_ready((s_bf, mu_bf, lv_bf))
    assert jnp.allclose(s_bf, ref_sample, atol=1e-1, rtol=1e-1)
    assert jnp.allclose(mu_bf, ref_mu, atol=1e-1, rtol=1e-1)
    assert jnp.allclose(lv_bf, ref_lv, atol=1e-1, rtol=1e-1)

    print("KERNEL_OK")
</pallas_src>

<mosaic_0001>
module attributes {stable_mosaic.version = 11 : i64} {
  func.func @gaussian_merge_kernel(%arg0: i32, %arg1: memref<8x32xf32, #tpu.memory_space<vmem>>, %arg2: memref<8x32xf32, #tpu.memory_space<vmem>>, %arg3: memref<8x32xf32, #tpu.memory_space<vmem>>, %arg4: memref<32x64xf32, #tpu.memory_space<vmem>>, %arg5: memref<1x64xf32, #tpu.memory_space<vmem>>, %arg6: memref<8x32xf32, #tpu.memory_space<vmem>>, %arg7: memref<8x32xf32, #tpu.memory_space<vmem>>, %arg8: memref<8x32xf32, #tpu.memory_space<vmem>>, %arg9: memref<8x32xf32, #tpu.memory_space<vmem>>) attributes {dimension_semantics = [#tpu.dimension_semantics<parallel>], iteration_bounds = array<i64: 2>, scalar_prefetch = 0 : i64, scratch_operands = 0 : i64, tpu.core_type = #tpu.core_type<tc>, window_params = [{transform_indices = @transform_0, window_bounds = array<i64: 8, 32>}, {transform_indices = @transform_1, window_bounds = array<i64: 8, 32>}, {transform_indices = @transform_2, window_bounds = array<i64: 8, 32>}, {pipeline_mode = #tpu.pipeline_mode<synchronous>, transform_indices = @transform_3, window_bounds = array<i64: 32, 64>}, {pipeline_mode = #tpu.pipeline_mode<synchronous>, transform_indices = @transform_4, window_bounds = array<i64: 1, 64>}, {transform_indices = @transform_5, window_bounds = array<i64: 8, 32>}, {transform_indices = @transform_6, window_bounds = array<i64: 8, 32>}, {transform_indices = @transform_7, window_bounds = array<i64: 8, 32>}, {transform_indices = @transform_8, window_bounds = array<i64: 8, 32>}]} {
    %c0 = arith.constant 0 : index
    %c0_0 = arith.constant 0 : index
    %0 = vector.load %arg1[%c0, %c0_0] : memref<8x32xf32, #tpu.memory_space<vmem>>, vector<8x32xf32>
    %c0_1 = arith.constant 0 : index
    %c0_2 = arith.constant 0 : index
    %1 = vector.load %arg4[%c0_1, %c0_2] : memref<32x64xf32, #tpu.memory_space<vmem>>, vector<32x64xf32>
    %cst = arith.constant dense<0.000000e+00> : vector<8x64xf32>
    %2 = tpu.matmul %0, %1, %cst {dimension_numbers = #tpu.dot_dimension_numbers<[1], [0], [0], [1], [0, 0, 1, 1], [], []>} : vector<8x32xf32>, vector<32x64xf32>, vector<8x64xf32> -> vector<8x64xf32>
    %c0_3 = arith.constant 0 : index
    %c0_4 = arith.constant 0 : index
    %3 = vector.load %arg5[%c0_3, %c0_4] : memref<1x64xf32, #tpu.memory_space<vmem>>, vector<1x64xf32>
    %4 = vector.broadcast %3 : vector<1x64xf32> to vector<8x64xf32>
    %5 = arith.addf %2, %4 : vector<8x64xf32>
    %6 = vector.extract_strided_slice %5 {offsets = [0, 0], sizes = [8, 32], strides = [1, 1]} : vector<8x64xf32> to vector<8x32xf32>
    %7 = vector.extract_strided_slice %5 {offsets = [0, 32], sizes = [8, 32], strides = [1, 1]} : vector<8x64xf32> to vector<8x32xf32>
    %c0_5 = arith.constant 0 : index
    %c0_6 = arith.constant 0 : index
    %8 = vector.load %arg3[%c0_5, %c0_6] : memref<8x32xf32, #tpu.memory_space<vmem>>, vector<8x32xf32>
    %cst_7 = arith.constant 0.000000e+00 : f32
    %9 = vector.broadcast %cst_7 : f32 to vector<8x32xf32>
    %10 = arith.subf %9, %8 : vector<8x32xf32>
    %11 = math.exp %10 : vector<8x32xf32>
    %cst_8 = arith.constant 0.000000e+00 : f32
    %12 = vector.broadcast %cst_8 : f32 to vector<8x32xf32>
    %13 = arith.subf %12, %7 : vector<8x32xf32>
    %14 = math.exp %13 : vector<8x32xf32>
    %15 = arith.addf %11, %14 : vector<8x32xf32>
    %16 = tpu.reciprocal %15 : vector<8x32xf32> -> vector<8x32xf32>
    %c0_9 = arith.constant 0 : index
    %c0_10 = arith.constant 0 : index
    %17 = vector.load %arg2[%c0_9, %c0_10] : memref<8x32xf32, #tpu.memory_space<vmem>>, vector<8x32xf32>
    %18 = arith.mulf %17, %11 : vector<8x32xf32>
    %19 = arith.mulf %6, %14 : vector<8x32xf32>
    %20 = arith.addf %18, %19 : vector<8x32xf32>
    %21 = arith.mulf %20, %16 : vector<8x32xf32>
    %cst_11 = arith.constant 9.99999993E-9 : f32
    %22 = vector.broadcast %cst_11 : f32 to vector<8x32xf32>
    %23 = arith.addf %16, %22 : vector<8x32xf32>
    %24 = math.log %23 : vector<8x32xf32>
    %cst_12 = arith.constant 9.99999993E-9 : f32
    %25 = vector.broadcast %cst_12 : f32 to vector<8x32xf32>
    %26 = arith.addf %16, %25 : vector<8x32xf32>
    %27 = math.sqrt %26 : vector<8x32xf32>
    %c0_13 = arith.constant 0 : index
    %c0_14 = arith.constant 0 : index
    %28 = vector.load %arg6[%c0_13, %c0_14] : memref<8x32xf32, #tpu.memory_space<vmem>>, vector<8x32xf32>
    %29 = arith.mulf %28, %27 : vector<8x32xf32>
    %30 = arith.addf %21, %29 : vector<8x32xf32>
    %c0_15 = arith.constant 0 : index
    %c0_16 = arith.constant 0 : index
    %31 = vector.load %arg7[%c0_15, %c0_16] : memref<8x32xf32, #tpu.memory_space<vmem>>, vector<8x32xf32>
    tpu.vector_store %arg7[%c0_15, %c0_16], %30 {strides = array<i32>} : memref<8x32xf32, #tpu.memory_space<vmem>>, vector<8x32xf32>,
    %c0_17 = arith.constant 0 : index
    %c0_18 = arith.constant 0 : index
    %32 = vector.load %arg8[%c0_17, %c0_18] : memref<8x32xf32, #tpu.memory_space<vmem>>, vector<8x32xf32>
    tpu.vector_store %arg8[%c0_17, %c0_18], %21 {strides = array<i32>} : memref<8x32xf32, #tpu.memory_space<vmem>>, vector<8x32xf32>,
    %c0_19 = arith.constant 0 : index
    %c0_20 = arith.constant 0 : index
    %33 = vector.load %arg9[%c0_19, %c0_20] : memref<8x32xf32, #tpu.memory_space<vmem>>, vector<8x32xf32>
    tpu.vector_store %arg9[%c0_19, %c0_20], %24 {strides = array<i32>} : memref<8x32xf32, #tpu.memory_space<vmem>>, vector<8x32xf32>,
    return
  }
  func.func @transform_0(%arg0: i32) -> (i32, i32) {
    %c0_i32 = arith.constant 0 : i32
    %c0_i32_0 = arith.constant 0 : i32
    return %arg0, %c0_i32 : i32, i32
  }
  func.func @transform_1(%arg0: i32) -> (i32, i32) {
    %c0_i32 = arith.constant 0 : i32
    %c0_i32_0 = arith.constant 0 : i32
    return %arg0, %c0_i32 : i32, i32
  }
  func.func @transform_2(%arg0: i32) -> (i32, i32) {
    %c0_i32 = arith.constant 0 : i32
    %c0_i32_0 = arith.constant 0 : i32
    return %arg0, %c0_i32 : i32, i32
  }
  func.func @transform_3(%arg0: i32) -> (i32, i32) {
    %c0_i32 = arith.constant 0 : i32
    %c0_i32_0 = arith.constant 0 : i32
    %c0_i32_1 = arith.constant 0 : i32
    return %c0_i32, %c0_i32_0 : i32, i32
  }
  func.func @transform_4(%arg0: i32) -> (i32, i32) {
    %c0_i32 = arith.constant 0 : i32
    %c0_i32_0 = arith.constant 0 : i32
    %c0_i32_1 = arith.constant 0 : i32
    return %c0_i32, %c0_i32_0 : i32, i32
  }
  func.func @transform_5(%arg0: i32) -> (i32, i32) {
    %c0_i32 = arith.constant 0 : i32
    %c0_i32_0 = arith.constant 0 : i32
    return %arg0, %c0_i32 : i32, i32
  }
  func.func @transform_6(%arg0: i32) -> (i32, i32) {
    %c0_i32 = arith.constant 0 : i32
    %c0_i32_0 = arith.constant 0 : i32
    return %arg0, %c0_i32 : i32, i32
  }
  func.func @transform_7(%arg0: i32) -> (i32, i32) {
    %c0_i32 = arith.constant 0 : i32
    %c0_i32_0 = arith.constant 0 : i32
    return %arg0, %c0_i32 : i32, i32
  }
  func.func @transform_8(%arg0: i32) -> (i32, i32) {
    %c0_i32 = arith.constant 0 : i32
    %c0_i32_0 = arith.constant 0 : i32
    return %arg0, %c0_i32 : i32, i32
  }
}

</mosaic_0001>

<bundles_post_ra>
// kernel: tpu_custom_call.1
= control target key start
LH: loop header
LB: loop body
LE: loop exit
PB: predicated region body
PF: predicated region fallthrough
CT: control target
= control target key end

     0   :  { %s1650_s0 = inlined_call_operand.hbm [shape: f32[16,32], index: 0, kind: input, shape index: {}]   ;;  %s1651_s1 = inlined_call_operand.hbm [shape: f32[16,32], index: 1, kind: input, shape index: {}]   ;;  %s1652_s2 = inlined_call_operand.hbm [shape: f32[16,32], index: 2, kind: input, shape index: {}]   ;;  %s1653_s3 = inlined_call_operand.hbm [shape: f32[32,64], index: 3, kind: input, shape index: {}]   ;;  %s1654_s4 = inlined_call_operand.vmem [shape: f32[1,64], index: 4, kind: input, shape index: {}]   ;;  %s1655_s5 = inlined_call_operand.vmem [shape: f32[16,32], index: 5, kind: input, shape index: {}]   ;;  %s1656_s6 = inlined_call_operand.hbm [shape: f32[16,32], index: 6, kind: output, shape index: {0}]   ;;  %s1657_s7 = inlined_call_operand.hbm [shape: f32[16,32], index: 7, kind: output, shape index: {1}]   ;;  %s1658_s8 = inlined_call_operand.hbm [shape: f32[16,32], index: 8, kind: output, shape index: {2}]  }
   0x1   :  { %1679 = sst [smem:[#allocation24_spill]] %s1651_s1 }
   0x2   :  { %1680 = sst [smem:[#allocation25_spill]] %s1655_s5 }
   0x3   :  { %1681 = sst [smem:[#allocation26_spill]] %s1656_s6 }
   0x4   :  { %1682 = sst [smem:[#allocation27_spill]] %s1657_s7 }
   0x5   :  { %1683 = sst [smem:[#allocation28_spill]] %s1658_s8 }
   0x6   :  { %14 = vsyncpa [#allocation3], 0 }
   0x7   :  { %16 = vsyncpa [#allocation3 + $0x1], 0 }
   0x8   :  { %17 = vsyncpa [#allocation6], 0 }
   0x9   :  { %19 = vsyncpa [#allocation6 + $0x1], 0 }
   0xa   :  { %20 = vsyncpa [#allocation9], 0 }
   0xb   :  { %21 = vsyncpa [#allocation4], 0 }
   0xc   :  { %23 = vsyncpa [#allocation4 + $0x1], 0 }
   0xd   :  { %24 = vsyncpa [#allocation12], 0 }
   0xe   :  { %26 = vsyncpa [#allocation12 + $0x1], 0  ;;  %s1264_s27 = smov 0   ;;  %s1266_s28 = smov 0  }
   0xf   :  { %s1268_s29 = smov 0   ;;  %s1270_s30 = smov 0  }
  0x10 LB: > { %1684 = sst [smem:[#allocation19_spill]] %s1192_s27  ;;  %s1285_s9 = sadd.s32 1, %s1204_s30   ;;  %s1204_s30 = sphi %s1270_s30, %s1718_s30   ;;  %s1200_s29 = sphi %s1268_s29, %s1722_s29   ;;  %s1196_s28 = sphi %s1266_s28, %s1721_s28   ;;  %s1192_s27 = sphi %s1264_s27, %s1720_s27  }
  0x11   : > { %1685 = sst [smem:[#allocation20_spill]] %s1204_s30  ;;  %s39_s10 = sadd.s32 1, %s1200_s29 }
  0x12   : > { %1686 = sst [smem:[#allocation21_spill]] %s1285_s9  ;;  %s36_s11 = ssub.s32 %s1204_s30, %s1285_s9 }
  0x13   : > { %p1659_p0 = scmp.ne.s32.totalorder %s1200_s29, %s1196_s28  ;;  %p37_p1 = scmp.eq.s32.totalorder %s36_s11, 0 }
  0x14   : > { %p47_p2 = scmp.eq.s32.totalorder %s1204_s30, 0  ;;  %p900_p4 = scmp.lt.s32.totalorder %s1204_s30, 2 }
  0x15   : > { %s1296_s12 = scalar_select %p37_p1, %s1200_s29, %s39_s10  }
  0x16   : > { %p48_p5 = por %p47_p2, %p1659_p0  ;;  %s1661_s13 = sand.u32 1, %s1200_s29  }
  0x17   : > { %1687 = sst [smem:[#allocation22_spill]] %s1296_s12  ;;  %s1304_s14 = sshll.u32 %s1661_s13, 3 }
  0x18   : > { %s1307_s15 = sshll.u32 %s1204_s30, 7  ;;  %p1309_p6 = pnand %p900_p4, %p48_p5 }
  0x19   : > { %s308_s17 = sand.u32 1, %s1204_s30   ;;  %s1689_s1 = sld [smem:[#allocation24_spill]] }
  0x1a   : > { %s1688_s16 = scalar_select %p1309_p6, 1, 0 }
  0x1b   : > { %s312_s21 = scalar_lea.vmem [#allocation5], %s1304_s14  ;;  %s1323_s23 = scalar_lea.sflag [#allocation6], %s308_s17 }
  0x1c   : > { %s319_s22 = sshll.u32 %s312_s21, 4  ;;  %p1329_p8 = pneg %p1309_p6  ;;  %s1321_s22 = int_to_ptr.vmem [resolvable:$true] %s319_s22 }
  0x1e   : > { %s1690_s25 = scalar_select %p1329_p8, 1, 0 }
  0x1f   : > { %s1318_s20 = scalar_lea.hbm %s1689_s1, %s1307_s15  ;;  %s957_s11 = scalar_lea.hbm %s1689_s1, 256 }
  0x20   : > { %s952_s24 = scalar_lea.hbm %s1318_s20, 128  ;;  %p958_p11 = scmp.lt.u32.totalorder %s1318_s20, %s1689_s1 }
  0x21   : > { %p953_p7 = scmp.ne.s32.totalorder %s1318_s20, %s952_s24  ;;  %p959_p12 = scmp.lt.u32.totalorder %s957_s11, %s952_s24 }
  0x22   : > { %p961_p1 = scmp.lt.u32.totalorder %s952_s24, %s1318_s20 }
  0x23   : > { %p955_p9 = pnand %p1329_p8, %p953_p7  ;;  %p960_p13 = por %p959_p12, %p958_p11 }
  0x25   : > { %p956_p10 = pneg %p955_p9  ;;  %p962_p2 = por %p961_p1, %p960_p13 }
  0x27   : > { %p963_p4 = pnand %p962_p2, %p956_p10 }
  0x29   : > { %966 = shalt.err (!%p963_p4)
}
  0x2a   : > { %s967_s17 = scalar_lea.vmem %s1321_s22, 128  ;;  %s1206_s21 = smov [#allocation5]  }
  0x2b   : > { %p968_p5 = scmp.ne.s32.totalorder %s1321_s22, %s967_s17  ;;  %s972_s26 = sshll.u32 %s1206_s21, 4  ;;  %s973_s26 = int_to_ptr.vmem [resolvable:$false] %s972_s26 }
  0x2c   : > { %s974_s10 = scalar_lea.vmem %s973_s26, 256  ;;  %p975_p3 = scmp.lt.s32.totalorder %s1321_s22, %s973_s26 }
  0x2d   : > { %p970_p7 = pnand %p968_p5, %p1329_p8  ;;  %p976_p0 = scmp.lt.s32.totalorder %s974_s10, %s967_s17 }
  0x2f   : > { %p971_p9 = pneg %p970_p7  ;;  %p977_p11 = por %p976_p0, %p975_p3 }
  0x31   : > { %p978_p12 = pnand %p977_p11, %p971_p9 }
  0x33   : > { %981 = shalt.err (!%p978_p12)
}
  0x34   : > { %885 = dma.hbm_to_vmem [thread:$0]  (!%p1309_p6), %s1318_s20, 128, %s1321_s22, %s1323_s23  }
  0x35   : > { %s1354_s24 = sadd.s32 4294967295, %s1204_s30   ;;  %s1660_s11 = sadd.s32 4294967294, %s1204_s30  }
  0x36   : > { %p52_p0 = scmp.ne.s32.totalorder %s1196_s28, %s1192_s27  ;;  %p1670_p3 = scmp.eq.s32.totalorder %s1354_s24, 0 }
  0x37   : > { %p196_p10 = scmp.eq.s32.totalorder %s1354_s24, 1  ;;  %p202_p13 = scmp.eq.s32.totalorder %s1660_s11, 1 }
  0x38   : > { %p1365_p1 = por %p1670_p3, %p52_p0  ;;  %p809_p2 = scmp.ge.s32.totalorder %s1204_s30, 1 }
  0x39   : > { %p1692_p4 = scmp.ne.s32.totalorder %s1200_s29, %s1196_s28  ;;  %p1377_p7 = por %p202_p13, %p52_p0 }
  0x3a   : > { %s1691_s18 = scalar_select %p1365_p1, 1, 0 }
  0x3b   : > { %p1373_p5 = por %p196_p10, %p1692_p4  ;;  %p261_p9 = scmp.lt.s32.totalorder %s1204_s30, 3 }
  0x3c   : > { %s1694_s22 = scalar_select %p1377_p7, 1, 0 }
  0x3d   : > { %s1693_s20 = scalar_select %p1373_p5, 1, 0 }
  0x3e   : > { %1695 = sst [smem:[#allocation23_spill]] %s1694_s22  ;;  %p1382_p11 = pnand %p809_p2, %p261_p9 }
  0x3f   : > { %s1207_s17 = smov [#allocation8]   ;;  %s1394_s11 = scalar_lea.hbm %s1650_s0, %s1307_s15 }
  0x40   : > { %s1696_s19 = scalar_select %p1382_p11, 1, 0 }
  0x41   : > { %s273_s21 = sshll.u32 %s1207_s17, 4  ;;  %p875_p12 = pneg %p1382_p11  ;;  %s1386_s21 = int_to_ptr.vmem [resolvable:$true] %s273_s21 }
  0x42   : > { %s294_s1 = scalar_lea.vmem [#allocation2], %s1304_s14  ;;  %s1409_s30 = scalar_lea.hbm %s1652_s2, %s1307_s15 }
  0x43   : > { %p1398_p0 = pnand %p875_p12, %p1670_p3  ;;  %s301_s12 = sshll.u32 %s294_s1, 4  ;;  %s1403_s12 = int_to_ptr.vmem [resolvable:$true] %s301_s12 }
  0x44   : > { %s982_s26 = scalar_lea.hbm %s1653_s3, 512 }
  0x45   : > { %p983_p10 = scmp.ne.s32.totalorder %s1653_s3, %s982_s26  ;;  %p984_p13 = pneg %p1398_p0 }
  0x46   : > { %p989_p9 = scmp.lt.u32.totalorder %s982_s26, %s1653_s3 }
  0x47   : > { %p985_p2 = pnand %p984_p13, %p983_p10 }
  0x49   : > { %p986_p4 = pneg %p985_p2 }
  0x4b   : > { %p991_p12 = pnand %p989_p9, %p986_p4 }
  0x4d   : > { %994 = shalt.err (!%p991_p12)
}
  0x4e   : > { %s995_s9 = scalar_lea.vmem %s1386_s21, 512  ;;  %p1003_p1 = scmp.lt.s32.totalorder %s1386_s21, %s1386_s21 }
  0x4f   : > { %p996_p3 = scmp.ne.s32.totalorder %s1386_s21, %s995_s9  ;;  %p1004_p11 = scmp.lt.s32.totalorder %s995_s9, %s995_s9 }
  0x51   : > { %p998_p7 = pnand %p996_p3, %p984_p13  ;;  %p1005_p6 = por %p1004_p11, %p1003_p1 }
  0x53   : > { %p999_p5 = pneg %p998_p7 }
  0x55   : > { %p1006_p8 = pnand %p1005_p6, %p999_p5 }
  0x57   : > { %1009 = shalt.err (!%p1006_p8)
}
  0x58   : > { %s1208_s6 = smov 128   ;;  %s1209_s8 = smov 8  }
  0x59   : > { %878 = dma.hbm_to_vmem [thread:$0]  (!%p1398_p0), %s1653_s3, 512, %s1386_s21, [#allocation9], %s1208_s6, %s1208_s6, %s1209_s8  }
  0x5a   : > { %s1698_s22 = sand.u32 1, %s1200_s29   ;;  %s1010_s26 = scalar_lea.hbm %s1394_s11, 128 }
  0x5b   : > { %s291_s17 = scalar_lea.sflag [#allocation3], %s1698_s22  ;;  %p1011_p6 = scmp.ne.s32.totalorder %s1394_s11, %s1010_s26 }
  0x5c   : > { %p1699_p8 = scmp.ne.s32.totalorder %s1690_s25, 0  ;;  %s1015_s9 = scalar_lea.hbm %s1650_s0, 256 }
  0x5d   : > { %p1016_p5 = scmp.lt.u32.totalorder %s1394_s11, %s1650_s0  ;;  %p1017_p7 = scmp.lt.u32.totalorder %s1015_s9, %s1010_s26 }
  0x5e   : > { %p1013_p3 = pnand %p1011_p6, %p1699_p8  ;;  %p1019_p10 = scmp.lt.u32.totalorder %s1010_s26, %s1394_s11 }
  0x5f   : > { %p1018_p11 = por %p1017_p7, %p1016_p5 }
  0x60   : > { %p1014_p1 = pneg %p1013_p3 }
  0x61   : > { %p1020_p13 = por %p1019_p10, %p1018_p11 }
  0x63   : > { %p1021_p0 = pnand %p1020_p13, %p1014_p1 }
  0x65   : > { %1024 = shalt.err (!%p1021_p0)
}
  0x66   : > { %s1025_s13 = scalar_lea.vmem %s1403_s12, 128  ;;  %s1210_s21 = smov [#allocation2]  }
  0x67   : > { %p1026_p2 = scmp.ne.s32.totalorder %s1403_s12, %s1025_s13  ;;  %s1030_s6 = sshll.u32 %s1210_s21, 4  ;;  %s1031_s6 = int_to_ptr.vmem [resolvable:$false] %s1030_s6 }
  0x68   : > { %s1032_s5 = scalar_lea.vmem %s1031_s6, 256  ;;  %p1033_p12 = scmp.lt.s32.totalorder %s1403_s12, %s1031_s6 }
  0x69   : > { %p1028_p4 = pnand %p1026_p2, %p1699_p8  ;;  %p1034_p6 = scmp.lt.s32.totalorder %s1032_s5, %s1025_s13 }
  0x6b   : > { %p1029_p9 = pneg %p1028_p4  ;;  %p1035_p3 = por %p1034_p6, %p1033_p12 }
  0x6d   : > { %p1036_p5 = pnand %p1035_p3, %p1029_p9 }
  0x6f   : > { %1039 = shalt.err (!%p1036_p5)
}
  0x70   : > { %p1700_p1 = scmp.ne.s32.totalorder %s1688_s16, 0  ;;  %s330_s7 = scalar_lea.vmem [#allocation7], %s1304_s14 }
  0x71   : > { %s337_s8 = sshll.u32 %s330_s7, 4  ;;  %s1040_s27 = scalar_lea.hbm %s1409_s30, 128  ;;  %s338_s8 = int_to_ptr.vmem [resolvable:$true] %s337_s8 }
  0x72   : > { %882 = dma.hbm_to_vmem [thread:$0]  (!%p1700_p1), %s1394_s11, 128, %s1403_s12, %s291_s17  }
  0x73   : > { %p1041_p7 = scmp.ne.s32.totalorder %s1409_s30, %s1040_s27  ;;  %s1045_s26 = scalar_lea.hbm %s1652_s2, 256 }
  0x74   : > { %p1046_p13 = scmp.lt.u32.totalorder %s1409_s30, %s1652_s2  ;;  %p1047_p0 = scmp.lt.u32.totalorder %s1045_s26, %s1040_s27 }
  0x75   : > { %p1043_p11 = pnand %p1041_p7, %p1699_p8  ;;  %p1049_p4 = scmp.lt.u32.totalorder %s1040_s27, %s1409_s30 }
  0x76   : > { %p1048_p2 = por %p1047_p0, %p1046_p13 }
  0x77   : > { %p1044_p10 = pneg %p1043_p11 }
  0x78   : > { %p1050_p9 = por %p1049_p4, %p1048_p2 }
  0x7a   : > { %p1051_p12 = pnand %p1050_p9, %p1044_p10 }
  0x7c   : > { %1054 = shalt.err (!%p1051_p12)
}
  0x7d   : > { %s1055_s12 = scalar_lea.vmem %s338_s8, 128  ;;  %s1211_s14 = smov [#allocation7]  }
  0x7e   : > { %p1056_p6 = scmp.ne.s32.totalorder %s338_s8, %s1055_s12  ;;  %s1060_s11 = sshll.u32 %s1211_s14, 4  ;;  %s1061_s11 = int_to_ptr.vmem [resolvable:$false] %s1060_s11 }
  0x7f   : > { %s1062_s17 = scalar_lea.vmem %s1061_s11, 256  ;;  %p1063_p7 = scmp.lt.s32.totalorder %s338_s8, %s1061_s11 }
  0x80   : > { %p1058_p3 = pnand %p1056_p6, %p1699_p8  ;;  %p1064_p11 = scmp.lt.s32.totalorder %s1062_s17, %s1055_s12 }
  0x82   : > { %p1059_p5 = pneg %p1058_p3  ;;  %p1065_p1 = por %p1064_p11, %p1063_p7 }
  0x84   : > { %p1066_p0 = pnand %p1065_p1, %p1059_p5 }
  0x86   : > { %1069 = shalt.err (!%p1066_p0)
}
  0x87   : > { %p1701_p13 = scmp.ne.s32.totalorder %s1688_s16, 0  ;;  %p1702_p10 = scmp.ne.s32.totalorder %s1696_s19, 0 }
  0x88   : > { %s1477_s25 = sand.u32 (!%p1702_p10), 1, %s1196_s28   ;;  %p1703_p8 = scmp.ne.s32.totalorder (!%p1702_p10), %s1691_s18, 0 }
  0x89   : > { %888 = dma.hbm_to_vmem [thread:$0]  (!%p1701_p13), %s1409_s30, 128, %s338_s8, %s1323_s23  }
  0x8a   : > { %353 = sbr.rel (%p1702_p10) target bundleno = 588 (0x24c), region = 44  ;;  %s1480_s9 = sshll.u32 (!%p1702_p10), %s1477_s25, 3 }
  0x8b   : > { %s356_s13 = scalar_lea.sflag (!%p1702_p10), [#allocation3], %s1477_s25  ;;  %s359_s21 = scalar_lea.vmem (!%p1702_p10), [#allocation2], %s1480_s9 }
  0x91   : > { %1171 = dma.done.wait (%p1703_p8), %s356_s13, 128  }
  0x92   : > { %1173 = vsyncadd (%p1703_p8), %s356_s13, 4294967168  ;;  %s364_s30 = sand.u32 1, %s1354_s24   ;;  %s368_s23 = scalar_lea.vmem [#allocation5], %s1480_s9 }
  0x93   : > { %s365_s16 = scalar_lea.sflag [#allocation6], %s364_s30 }
  0x94   : > { %1175 = dma.done.wait (%p1703_p8), %s365_s16, 256  }
  0x95   : > { %1177 = vsyncadd (%p1703_p8), %s365_s16, 4294967040  ;;  %s377_s19 = scalar_lea.vmem [#allocation7], %s1480_s9  ;;  %p1704_p1 = scmp.eq.s32.totalorder %s1354_s24, 0 }
  0x97   : > { %1179 = dma.done.wait (%p1704_p1), [#allocation9], 512   ;;  %p1705_p2 = pmov %p1704_p1 }
  0x98   : > { %v1212_v0 = vmov 0.0|0.0   ;;  %vm1213_vm0 = vmmov 0   ;;  %v1214_v1 = vmov 0.0   ;;  %v443_v2 = vld [vmem:[#allocation8] sm:$0xff]  ;;  %v444_v3 = vld [vmem:[#allocation8 + $0x8] sm:$0xff]  ;;  %v445_v4 = vld [vmem:[#allocation8 + $0x10] sm:$0xff] }
  0x99   : > { %1181 = vsyncadd (%p1705_p2), [#allocation9], 4294966784  ;;  %853 = vmatprep.subr.bf16.mxu0 %v1212_v0  ;;  %850 = vmatprep.mubr.msk.f32.mxu0 %vm1213_vm0, %v1214_v1  ;;  %v854_v5 = vpack.c.bf16 %v444_v3, %v443_v2  ;;  %v446_v6 = vld [vmem:[#allocation8 + $0x18] sm:$0xff]  ;;  %vm454_vm1 = vcmask 261120   ;;  %v827_v9 = vld [vmem:[%s1654_s4] ss:$0 sm:$0xff] }
  0x9a   : > { %v857_v7 = vpack.c.bf16 %v446_v6, %v445_v4  ;;  %v442_v8 = vld [vmem:[%s359_s21] sm:$0xff]  ;;  %s1215_s5 = smov 96   ;;  %v541_v22 = vld [vmem:[%s368_s23] sm:$0xff]  ;;  %s1510_s7 = sshll.u32 %s1354_s24, 7 }
  0x9b   : > { %855 = vmatpush3.bf16.msra.mxu0 %v854_v5  ;;  %v528_v16 = vld [vmem:[%s377_s19] sm:$0xff]  ;;  %s430_s8 = scalar_lea.vmem [#allocation11], %s1480_s9  ;;  %p438_p4 = scmp.lt.s32.totalorder %s1354_s24, 1 }
  0x9c   : > { %856 = vmatprep.subr.bf16.mxu0 %v1212_v0  ;;  %v529_v17 = vsub.f32 0.0, %v528_v16  ;;  %s599_s27 = sshll.u32 %s430_s8, 4  ;;  %s1706_s26 = sld [smem:[#allocation27_spill]]  ;;  %s1522_s27 = int_to_ptr.vmem [resolvable:$true] %s599_s27 }
  0x9d   : > { %s1528_s1 = scalar_lea.sflag [#allocation12], %s364_s30  ;;  %s1070_s12 = scalar_lea.vmem %s1522_s27, 128 }
  0x9e   : > { %v530_v18 = vmul.f32 1.442695, %v529_v17  ;;  %p1071_p9 = scmp.ne.s32.totalorder %s1522_s27, %s1070_s12  ;;  %p1707_p12 = scmp.ne.s32.totalorder %s1693_s20, 0 }
  0x9f   : > { %858 = vmatpush3.bf16.msra.mxu0 %v857_v7  ;;  %s1216_s14 = smov [#allocation11]  }
  0xa0   : > { %p1072_p6 = pnand %p1071_p9, %p1707_p12  ;;  %s1074_s11 = sshll.u32 %s1216_s14, 4  ;;  %s1075_s11 = int_to_ptr.vmem [resolvable:$false] %s1074_s11 }
  0xa1   : > { %s1076_s17 = scalar_lea.vmem %s1075_s11, 256  ;;  %p1077_p5 = scmp.lt.s32.totalorder %s1522_s27, %s1075_s11 }
  0xa2   : > { %851 = vmatmul.mubr.msk.f32.vlgmr.msra.gmra.mrb[0].mxu0 %vm454_vm1, %v442_v8  ;;  %s1520_s10 = scalar_lea.hbm %s1706_s26, %s1510_s7  ;;  %p1073_p3 = pneg %p1072_p6 }
  0xa3   : > { %p1078_p7 = scmp.lt.s32.totalorder %s1076_s17, %s1070_s12 }
  0xa5   : > { %p1079_p11 = por %p1078_p7, %p1077_p5 }
  0xa7   : > { %p1080_p0 = pnand %p1079_p11, %p1073_p3 }
 0x175   : > { %v524_v10 = vpop.f32.mrb[0].mxu0 }
 0x176   : > { %v525_v11 = vadd.f32 %v827_v9, %v524_v10  ;;  %v852_v12 = vpop.f32.mrb[1].mxu0 }
 0x178   : > { %v532_v13 = vsub.f32 0.0, %v525_v11 }
 0x17a   : > { %v533_v14 = vmul.f32 1.442695, %v532_v13 }
 0x17c   : > { %942 = vpow2.f32 %v533_v14 }
 0x17d   : > { %944 = vpow2.f32 %v530_v18 }
 0x186   : > { %v943_v15 = vpop.eup %942 }
 0x187   : > { %536 = vrot.lane.b32.xlu0 %v943_v15, %s1215_s5  ;;  %v945_v19 = vpop.eup %944 }
 0x188   : > { %v542_v23 = vmul.f32 %v945_v19, %v541_v22 }
 0x1f9   : > { %v537_v20 = vpop.permute.xlu0 %536 }
 0x1fa   : > { %v539_v21 = vadd.f32 %v945_v19, %v537_v20  ;;  %v543_v24 = vmul.f32 %v537_v20, %v525_v11 }
 0x1fc   : > { %946 = vrcp.f32 %v539_v21  ;;  %v544_v25 = vadd.f32 %v543_v24, %v542_v23 }
 0x206   : > { %v947_v26 = vpop.eup %946 }
 0x207   : > { %v1514_v27 = vmul.f32 %v947_v26, %v544_v25  ;;  %v546_v28 = vadd.f32 1e-08, %v947_v26 }
 0x209   : > { %948 = vrsqrt.f32 %v546_v28  ;;  %560 = vst.msk [vmem:[%s430_s8] sm:$0xff] %vm454_vm1, %v1514_v27 }
 0x20a   : > { %1083 = shalt.err (!%p1080_p0)
}
 0x20b   : > { %s1084_s13 = scalar_lea.hbm %s1520_s10, 128  ;;  %s1088_s16 = scalar_lea.hbm %s1706_s26, 256 }
 0x20c   : > { %p1085_p13 = scmp.ne.s32.totalorder %s1520_s10, %s1084_s13  ;;  %p1089_p1 = scmp.lt.u32.totalorder %s1520_s10, %s1706_s26 }
 0x20d   : > { %p1090_p2 = scmp.lt.u32.totalorder %s1088_s16, %s1084_s13  ;;  %p1092_p6 = scmp.lt.u32.totalorder %s1084_s13, %s1520_s10 }
 0x20e   : > { %p1086_p10 = pnand %p1085_p13, %p1707_p12 }
 0x20f   : > { %p1091_p9 = por %p1090_p2, %p1089_p1 }
 0x210   : > { %p1087_p8 = pneg %p1086_p10 }
 0x211   : > { %p1093_p3 = por %p1092_p6, %p1091_p9 }
 0x213   : > { %p1094_p5 = pnand %p1093_p3, %p1087_p8 }
 0x215   : > { %1097 = shalt.err (!%p1094_p5)
}
 0x216   : > { %870 = dma.vmem_to_hbm [thread:$0]  (%p1707_p12), %s1522_s27, 128, %s1520_s10, %s1528_s1   ;;  %950 = vlog2.f32 %v546_v28  ;;  %v949_v29 = vpop.eup %948  ;;  %vm551_vm2 = vcmp.eq.f32.partialorder %v546_v28, inf  ;;  %v554_v32 = vand.u32 2147483648, %v546_v28  ;;  %vm553_vm3 = vcmp.eq.f32.partialorder %v546_v28, 0.0 }
 0x217   : > { %s1724_s24 = smov (!%p438_p4, %s1354_s24), 1  ;;  %s1708_s8 = sld [smem:[#allocation25_spill]]  ;;  %v550_v31 = vmul.f32 %v949_v29, %v546_v28 }
 0x218   : > { %s826_s18 = sshll.u32 %s1724_s24, 3  ;;  %s437_s22 = scalar_lea.vmem [#allocation13], %s1480_s9 }
 0x219   : > { %s612_s12 = sshll.u32 %s437_s22, 4  ;;  %s1709_s14 = sld [smem:[#allocation28_spill]]  ;;  %v552_v35 = vsel %vm551_vm2, %v546_v28, %v550_v31  ;;  %s1565_s12 = int_to_ptr.vmem [resolvable:$true] %s612_s12 }
 0x21a   : > { %v555_v36 = vsel %vm553_vm3, %v554_v32, %v552_v35  ;;  %s423_s11 = scalar_lea.vmem [#allocation10], %s1480_s9  ;;  %s1098_s13 = scalar_lea.vmem %s1565_s12, 128 }
 0x21b   : > { %s1570_s17 = sshll.u32 %s423_s11, 4  ;;  %p1099_p4 = scmp.ne.s32.totalorder %s1565_s12, %s1098_s13  ;;  %s1603_s17 = int_to_ptr.vmem [resolvable:$true] %s1570_s17 }
 0x21c   : > { %s1217_s21 = smov [#allocation13]  }
 0x21d   : > { %s441_s15 = scalar_lea.vmem %s1708_s8, %s826_s18  ;;  %p1100_p7 = pnand %p1099_p4, %p1707_p12 }
 0x21e   : > { %v556_v33 = vld [vmem:[%s441_s15] sm:$0xff]  ;;  %s1102_s30 = sshll.u32 %s1217_s21, 4  ;;  %s1103_s30 = int_to_ptr.vmem [resolvable:$false] %s1102_s30 }
 0x21f   : > { %s1563_s24 = scalar_lea.hbm %s1709_s14, %s1510_s7  ;;  %v557_v37 = vmul.f32 %v556_v33, %v555_v36  ;;  %p1101_p11 = pneg %p1100_p7 }
 0x220   : > { %v951_v30 = vpop.eup %950  ;;  %s1104_s16 = scalar_lea.vmem %s1103_s30, 256  ;;  %p1105_p0 = scmp.lt.s32.totalorder %s1565_s12, %s1103_s30 }
 0x221   : > { %v548_v34 = vmul.f32 0.6931472, %v951_v30  ;;  %p1106_p13 = scmp.lt.s32.totalorder %s1104_s16, %s1098_s13 }
 0x223   : > { %561 = vst.msk [vmem:[%s437_s22] sm:$0xff] %vm454_vm1, %v548_v34  ;;  %p1107_p10 = por %p1106_p13, %p1105_p0 }
 0x225   : > { %p1108_p8 = pnand %p1107_p10, %p1101_p11 }
 0x227   : > { %1111 = shalt.err (!%p1108_p8)
}
 0x228   : > { %s1112_s23 = scalar_lea.hbm %s1563_s24, 128  ;;  %s1116_s6 = scalar_lea.hbm %s1709_s14, 256 }
 0x229   : > { %p1113_p1 = scmp.ne.s32.totalorder %s1563_s24, %s1112_s23  ;;  %p1117_p6 = scmp.lt.u32.totalorder %s1563_s24, %s1709_s14 }
 0x22a   : > { %p1118_p3 = scmp.lt.u32.totalorder %s1116_s6, %s1112_s23  ;;  %p1120_p4 = scmp.lt.u32.totalorder %s1112_s23, %s1563_s24 }
 0x22b   : > { %p1114_p2 = pnand %p1113_p1, %p1707_p12 }
 0x22c   : > { %p1119_p5 = por %p1118_p3, %p1117_p6 }
 0x22d   : > { %p1115_p9 = pneg %p1114_p2 }
 0x22e   : > { %p1121_p7 = por %p1120_p4, %p1119_p5 }
 0x230   : > { %p1122_p11 = pnand %p1121_p7, %p1115_p9 }
 0x232   : > { %1125 = shalt.err (!%p1122_p11)
}
 0x233   : > { %871 = dma.vmem_to_hbm [thread:$0]  (%p1707_p12), %s1565_s12, 128, %s1563_s24, %s1528_s1   ;;  %v558_v38 = vadd.f32 %v557_v37, %v1514_v27 }
 0x234   : > { %s1710_s27 = sld [smem:[#allocation26_spill]]  ;;  %s563_s21 = scalar_lea.sflag [#allocation4], %s1477_s25 }
 0x235   : > { %559 = vst.msk [vmem:[%s423_s11] sm:$0xff] %vm454_vm1, %v558_v38  ;;  %s1126_s30 = scalar_lea.vmem %s1603_s17, 128  ;;  %s1218_s1 = smov [#allocation10]  }
 0x236   : > { %p1127_p0 = scmp.ne.s32.totalorder %s1603_s17, %s1126_s30  ;;  %s1130_s12 = sshll.u32 %s1218_s1, 4  ;;  %s1131_s12 = int_to_ptr.vmem [resolvable:$false] %s1130_s12 }
 0x237   : > { %s1132_s24 = scalar_lea.vmem %s1131_s12, 256  ;;  %p1133_p8 = scmp.lt.s32.totalorder %s1603_s17, %s1131_s12 }
 0x238   : > { %p1128_p13 = pnand %p1127_p0, %p1707_p12  ;;  %p1134_p1 = scmp.lt.s32.totalorder %s1132_s24, %s1126_s30 }
 0x23a   : > { %s1711_s10 = smov %s1710_s27  ;;  %s1600_s13 = scalar_lea.hbm %s1710_s27, %s1510_s7 }
 0x23b   : > { %p1129_p10 = pneg %p1128_p13  ;;  %p1135_p2 = por %p1134_p1, %p1133_p8 }
 0x23d   : > { %p1136_p9 = pnand %p1135_p2, %p1129_p10 }
 0x23f   : > { %1139 = shalt.err (!%p1136_p9)
}
 0x240   : > { %s1140_s25 = scalar_lea.hbm %s1600_s13, 128  ;;  %s1144_s11 = scalar_lea.hbm %s1711_s10, 256 }
 0x241   : > { %p1141_p6 = scmp.ne.s32.totalorder %s1600_s13, %s1140_s25  ;;  %p1145_p4 = scmp.lt.u32.totalorder %s1600_s13, %s1711_s10 }
 0x242   : > { %p1146_p7 = scmp.lt.u32.totalorder %s1144_s11, %s1140_s25  ;;  %p1148_p0 = scmp.lt.u32.totalorder %s1140_s25, %s1600_s13 }
 0x243   : > { %p1142_p3 = pnand %p1141_p6, %p1707_p12 }
 0x244   : > { %p1147_p11 = por %p1146_p7, %p1145_p4 }
 0x245   : > { %p1143_p5 = pneg %p1142_p3 }
 0x246   : > { %p1149_p13 = por %p1148_p0, %p1147_p11 }
 0x248   : > { %p1150_p10 = pnand %p1149_p13, %p1143_p5 }
 0x24a   : > { %1153 = shalt.err (!%p1150_p10)
}
 0x24b   : > { %869 = dma.vmem_to_hbm [thread:$0]  (%p1707_p12), %s1603_s17, 128, %s1600_s13, %s563_s21  }
 0x24c PF: > { %s1712_s19 = sld [smem:[#allocation19_spill]]  ;;  %s1713_s18 = sld [smem:[#allocation23_spill]] }
 0x24d   : > { %s1714_s6 = sld [smem:[#allocation20_spill]] }
 0x252   : > { %s624_s5 = sand.u32 1, %s1712_s19   ;;  %p1715_p8 = scmp.ne.s32.totalorder %s1713_s18, 0 }
 0x253   : > { %p1716_p1 = scmp.ge.s32.totalorder %s1714_s6, 2  ;;  %s625_s8 = scalar_lea.sflag [#allocation4], %s624_s5 }
 0x255   : > { %p890_p2 = pnand %p1716_p1, %p1715_p8 }
 0x257   : > { %1183 = dma.done.wait (!%p890_p2), %s625_s8, 128  }
 0x258   : > { %1185 = vsyncadd (!%p890_p2), %s625_s8, 4294967168  ;;  %s1717_s15 = sadd.s32 4294967294, %s1714_s6  }
 0x259   : > { %s633_s22 = sand.u32 1, %s1717_s15  }
 0x25a   : > { %s634_s27 = scalar_lea.sflag [#allocation12], %s633_s22 }
 0x25b   : > { %1187 = dma.done.wait (!%p890_p2), %s634_s27, 256  }
 0x25c   : > { %1189 = vsyncadd (!%p890_p2), %s634_s27, 4294967040  ;;  %s1718_s30 = sld [smem:[#allocation21_spill]]  ;;  %s1719_s20 = sld [smem:[#allocation22_spill]] }
 0x25d   : > { %s1720_s27 = smov %s1196_s28  ;;  %s1721_s28 = smov %s1200_s29 }
 0x262   : > { %p29_p12 = scmp.ge.s32.totalorder %s1718_s30, 4   ;;  %s1722_s29 = smov %s1719_s20 }
 0x264   :  { %31 = sbr.rel (!%p29_p12) target bundleno = 16 (0x10), region = 152 }
 0x26b   :  { %648 = vsyncpa [#allocation3], 1 }
 0x26c   :  { %650 = vsyncpa [#allocation3 + $0x1], 1 }
 0x26d   :  { %651 = vsyncpa [#allocation6], 1 }
 0x26e   :  { %653 = vsyncpa [#allocation6 + $0x1], 1 }
 0x26f   :  { %654 = vsyncpa [#allocation9], 1 }
 0x270   :  { %655 = vsyncpa [#allocation4], 1 }
 0x271   :  { %657 = vsyncpa [#allocation4 + $0x1], 1 }
 0x272   :  { %658 = vsyncpa [#allocation12], 1 }
 0x273   :  { %660 = vsyncpa [#allocation12 + $0x1], 1 }

</bundles_post_ra>
